<compile_context>
chip_gen: v7x
topology: tpu7x:2x2x1
jax: 0.10.0
libtpu: 0.0.40
codegen_flags: <defaults>
</compile_context>

<pallas_src>
import functools

import jax
import jax.numpy as jnp
from jax.experimental import pallas as pl
from jax.experimental.pallas import tpu as pltpu

NEG_SLOPE = 0.01  # nn.LeakyReLU default


def _leaky_relu(x):
    return jnp.where(x > 0, x, NEG_SLOPE * x)


def _conv_embedding_kernel(
    cm_ref, idx_ref,
    wc_ref, bc_ref,
    etab_ref, be_ref,
    wmc_ref, wme_ref, bm_ref,
    out_ref, *, c_cont, k_emb, n_idx_rows,
):
    cm = cm_ref[0]                                 # (c_cont + 1, thw) f32
    mask = cm[c_cont:c_cont + 1, :]                # (1, thw)
    cont = cm[:c_cont, :] * mask                   # masked continuous channels

    # Single masked one-hot over the combined (keys x players) embedding axis.
    # Index planes are pre-offset in the wrapper so each plane targets a disjoint
    # k-range; summing the per-plane one-hots implements the player sum, and the
    # mask value is injected directly via the select (mask * embedding is linear).
    idx = idx_ref[0]                               # (n_idx_rows, thw) int32
    thw = idx.shape[-1]
    iota_k = jax.lax.broadcasted_iota(jnp.int32, (k_emb, thw), 0)   # hoisted once
    onehot = jnp.zeros((k_emb, thw), jnp.float32)
    for r in range(n_idx_rows):                    # static, tiny (2 * n_keys)
        onehot = onehot + jnp.where(idx[r:r + 1, :] == iota_k, mask, 0.0)

    # continuous_space_embedding: 1x1 conv + LeakyReLU (channel-major: W^T @ X)
    cont_out = _leaky_relu(
        jnp.dot(wc_ref[...], cont, preferred_element_type=jnp.float32) + bc_ref[...]
    )
    # embedding_merger: tables are pre-folded into the merger weights, so the
    # masked one-hot matmul yields the conv output directly.
    emb_out = _leaky_relu(
        jnp.dot(etab_ref[...], onehot, preferred_element_type=jnp.float32) + be_ref[...]
    )
    # merger: 1x1 conv on concat([cont_out, emb_out]) expressed as split weights
    out = (
        jnp.dot(wmc_ref[...], cont_out, preferred_element_type=jnp.float32)
        + jnp.dot(wme_ref[...], emb_out, preferred_element_type=jnp.float32)
        + bm_ref[...]
    )
    out_ref[0] = out.astype(out_ref.dtype)         # f32 accum -> bf16 on store


def _pick_hw_tile(hw, cap=2048):
    if hw <= cap:
        return hw
    for cand in (2048, 1024, 512, 256, 128):
        if hw % cand == 0:
            return cand
    return hw


def run_conv_embedding_layer(
    cm, idx, wc_T, bc_col, etab_T, be_col, wmc_T, wme_T, bm_col,
    *, thw=None, out_dtype=jnp.bfloat16,
):
    nb, c_cm, hw = cm.shape
    n_idx = idx.shape[1]
    out_dim = wc_T.shape[0]
    if thw is None:
        thw = _pick_hw_tile(hw)
    assert hw % thw == 0
    assert thw == hw or thw % 128 == 0

    kernel = functools.partial(
        _conv_embedding_kernel,
        c_cont=c_cm - 1, k_emb=etab_T.shape[1], n_idx_rows=n_idx,
    )

    def act_spec(c):
        return pl.BlockSpec((1, c, thw), lambda b, i: (b, 0, i))

    def wspec(arr):
        return pl.BlockSpec(arr.shape, lambda b, i: (0, 0))

    return pl.pallas_call(
        kernel,
        out_shape=jax.ShapeDtypeStruct((nb, out_dim, hw), out_dtype),
        grid_spec=pltpu.PrefetchScalarGridSpec(
            num_scalar_prefetch=0,
            grid=(nb, hw // thw),
            in_specs=[
                act_spec(c_cm),            # [cont channels | mask] packed, f32
                act_spec(n_idx),           # all index planes packed, int32
                wspec(wc_T), wspec(bc_col),
                wspec(etab_T), wspec(be_col),
                wspec(wmc_T), wspec(wme_T), wspec(bm_col),
            ],
            out_specs=pl.BlockSpec((1, out_dim, thw), lambda b, i: (b, 0, i)),
        ),
        compiler_params=pltpu.CompilerParams(
            dimension_semantics=("parallel", "parallel")),
    )(cm, idx, wc_T, bc_col, etab_T, be_col, wmc_T, wme_T, bm_col)


# ---------------- JAX glue (player-swap duplication / index prep; reshapes only) ----------------

def _dup_swap(t):
    """(b, 1, p, ...) -> (2b, p, ...): duplicate batch with player axis swapped, interleaved.

    Matches: t[:, :, [arange(p), arange(p)[::-1]], ...].transpose(1, 2).flatten(0, 1).flatten(1, 2)
    """
    v0 = t
    v1 = t[:, :, ::-1]
    stacked = jnp.stack([v0, v1], axis=1)                       # (b, 2, 1, p, ...)
    flat = stacked.reshape((t.shape[0] * 2,) + t.shape[1:])     # (2b, 1, p, ...)
    return flat.reshape(
        (flat.shape[0], flat.shape[1] * flat.shape[2]) + flat.shape[3:]
    )


def _offset_opponent(idx, num_embeddings):
    """out[:, 1] = where(out[:, 1] != 0, out[:, 1] + (num_embeddings - 1)//2, out[:, 1])"""
    off = (num_embeddings - 1) // 2
    ch1 = jnp.where(idx[:, 1] != 0, idx[:, 1] + off, idx[:, 1])
    return idx.at[:, 1].set(ch1)


if __name__ == "__main__":
    B, P, H, W = 2, 2, 16, 16
    EMB, OUT = 16, 32
    N_EMB_A = P * (2 - 1) + 1   # MultiBinary -> 3 (padding_idx=0)
    N_EMB_B = P * (4 - 1) + 1   # MultiDiscrete(nvec=4) -> 7
    C_CONT = P + 1              # cont_a (2 ch) + cont_b (1 ch)
    C_EMB = 2 * EMB             # two embedding keys, player-summed
    HW = H * W

    key = jax.random.PRNGKey(0)
    ks = jax.random.split(key, 13)

    obs = {
        "cont_a": jax.random.normal(ks[0], (B, 1, P, H, W), jnp.float32),
        "cont_b": jax.random.normal(ks[1], (B, 1, 1), jnp.float32),
        "disc_a": jax.random.randint(ks[2], (B, 1, P, H, W), 0, 2).astype(jnp.int32),
        "disc_b": jax.random.randint(ks[3], (B, 1, P, H, W), 0, 4).astype(jnp.int32),
    }
    input_mask = (jax.random.uniform(ks[4], (B, 1, H, W)) > 0.2).astype(jnp.float32)

    # deterministic synthetic parameters (shapes from the module __init__)
    def init(k, shape, scale=0.1):
        return scale * jax.random.normal(k, shape, jnp.float32)

    tab_a = init(ks[5], (N_EMB_A, EMB)).at[0].set(0.0)   # nn.Embedding(padding_idx=0) zeroes row 0
    tab_b = init(ks[6], (N_EMB_B, EMB))
    w_cont = init(ks[7], (C_CONT, OUT))                  # Conv2d(C_CONT, OUT, 1x1) as (in, out)
    b_cont = init(ks[8], (1, OUT))
    w_emb = init(ks[9], (C_EMB, OUT))                    # Conv2d(C_EMB, OUT, 1x1)
    b_emb = init(ks[10], (1, OUT))
    w_mrg = init(ks[11], (2 * OUT, OUT))                 # Conv2d(2*OUT, OUT, 1x1)
    b_mrg = init(ks[12], (1, OUT))

    # ----- forward-pass preprocessing (player duplication/swap, index offsets) -----
    mask2 = jnp.repeat(input_mask, 2, axis=0)            # repeat_interleave(input_mask, 2, dim=0)

    cont_a = _dup_swap(obs["cont_a"])                    # (2B, P, H, W)
    cont_b = _dup_swap(obs["cont_b"])                    # (2B, 1) non-spatial -> broadcast
    cont_b = jnp.broadcast_to(cont_b[:, :, None, None], (2 * B, 1, H, W))
    cont_all = jnp.concatenate([cont_a, cont_b], axis=1)  # (2B, C_CONT, H, W)

    idx_a = _offset_opponent(_dup_swap(obs["disc_a"]), N_EMB_A)   # (2B, P, H, W)
    idx_b = _offset_opponent(_dup_swap(obs["disc_b"]), N_EMB_B)

    # ----- kernel-input packing: NCHW kept, only reshapes (no transpose passes) -----
    cm = jnp.concatenate([cont_all, mask2], axis=1).reshape(2 * B, C_CONT + 1, HW)
    base_off = jnp.array(
        [p * N_EMB_A for p in range(P)]
        + [P * N_EMB_A + p * N_EMB_B for p in range(P)],
        dtype=jnp.int32,
    ).reshape(1, 2 * P, 1, 1)
    idx_comb = (jnp.concatenate([idx_a, idx_b], axis=1) + base_off).reshape(
        2 * B, 2 * P, HW
    )

    # ----- weight prep: channel-major transposes + fold tables into merger weights -----
    w_emb_a, w_emb_b = w_emb[:EMB], w_emb[EMB:]
    folded_a = tab_a @ w_emb_a                           # (N_EMB_A, OUT)
    folded_b = tab_b @ w_emb_b                           # (N_EMB_B, OUT)
    etab_T = jnp.concatenate([folded_a] * P + [folded_b] * P, axis=0).T  # (OUT, 20)
    wc_T = w_cont.T                                      # (OUT, C_CONT)
    wmc_T, wme_T = w_mrg[:OUT].T, w_mrg[OUT:].T          # (OUT, OUT) each
    bc_col, be_col, bm_col = b_cont.T, b_emb.T, b_mrg.T  # (OUT, 1) each

    out_chw = run_conv_embedding_layer(
        cm, idx_comb, wc_T, bc_col, etab_T, be_col, wmc_T, wme_T, bm_col,
        out_dtype=jnp.bfloat16,
    )
    out_chw = jax.block_until_ready(out_chw)

    # the module returns (merged_outs, input_mask); output already NCHW (free reshape)
    merged_outs = out_chw.reshape(2 * B, OUT, H, W)
    returned_mask = mask2

    # ----- pure-JAX reference (mirrors the PyTorch forward, unfolded weights) -----
    def reference():
        def embed(idx, tab):
            e = jnp.take(tab, idx, axis=0).sum(axis=1)           # (2B, H, W, EMB) player-sum
            return e.transpose(0, 3, 1, 2) * mask2               # (2B, EMB, H, W) masked

        emb_cat = jnp.concatenate([embed(idx_a, tab_a), embed(idx_b, tab_b)], axis=1)
        cont_masked = cont_all * mask2

        def conv1x1(x, w, b):
            return jnp.einsum("bchw,co->bohw", x, w) + b[0][None, :, None, None]

        c_out = _leaky_relu(conv1x1(cont_masked, w_cont, b_cont))
        e_out = _leaky_relu(conv1x1(emb_cat, w_emb, b_emb))
        m_in = jnp.concatenate([c_out, e_out], axis=1)
        return conv1x1(m_in, w_mrg, b_mrg)

    ref = reference()
    assert merged_outs.shape == (2 * B, OUT, H, W)
    assert returned_mask.shape == (2 * B, 1, H, W)
    max_err = float(jnp.max(jnp.abs(merged_outs.astype(jnp.float32) - ref)))
    assert max_err < 1e-2, f"mismatch vs reference (bf16 store tolerance): {max_err}"

    # TODO(synk): the '_COUNT' op branch (count-scaled embeddings) is not exercised by this
    # synthetic obs space; it would be one extra per-pixel multiply before the embedding merger.
    print("KERNEL_OK")
</pallas_src>

<mosaic_0001>
module attributes {stable_mosaic.version = 11 : i64} {
  func.func @_conv_embedding_kernel(%arg0: i32, %arg1: i32, %arg2: memref<1x4x256xf32, #tpu.memory_space<vmem>>, %arg3: memref<1x4x256xi32, #tpu.memory_space<vmem>>, %arg4: memref<32x3xf32, #tpu.memory_space<vmem>>, %arg5: memref<32x1xf32, #tpu.memory_space<vmem>>, %arg6: memref<32x20xf32, #tpu.memory_space<vmem>>, %arg7: memref<32x1xf32, #tpu.memory_space<vmem>>, %arg8: memref<32x32xf32, #tpu.memory_space<vmem>>, %arg9: memref<32x32xf32, #tpu.memory_space<vmem>>, %arg10: memref<32x1xf32, #tpu.memory_space<vmem>>, %arg11: memref<1x32x256xbf16, #tpu.memory_space<vmem>>) attributes {dimension_semantics = [#tpu.dimension_semantics<parallel>, #tpu.dimension_semantics<parallel>], iteration_bounds = array<i64: 4, 1>, scalar_prefetch = 0 : i64, scratch_operands = 0 : i64, tpu.core_type = #tpu.core_type<tc>, window_params = [{transform_indices = @transform_0, window_bounds = array<i64: 1, 4, 256>}, {transform_indices = @transform_1, window_bounds = array<i64: 1, 4, 256>}, {pipeline_mode = #tpu.pipeline_mode<synchronous>, transform_indices = @transform_2, window_bounds = array<i64: 32, 3>}, {pipeline_mode = #tpu.pipeline_mode<synchronous>, transform_indices = @transform_3, window_bounds = array<i64: 32, 1>}, {pipeline_mode = #tpu.pipeline_mode<synchronous>, transform_indices = @transform_4, window_bounds = array<i64: 32, 20>}, {pipeline_mode = #tpu.pipeline_mode<synchronous>, transform_indices = @transform_5, window_bounds = array<i64: 32, 1>}, {pipeline_mode = #tpu.pipeline_mode<synchronous>, transform_indices = @transform_6, window_bounds = array<i64: 32, 32>}, {pipeline_mode = #tpu.pipeline_mode<synchronous>, transform_indices = @transform_7, window_bounds = array<i64: 32, 32>}, {pipeline_mode = #tpu.pipeline_mode<synchronous>, transform_indices = @transform_8, window_bounds = array<i64: 32, 1>}, {transform_indices = @transform_9, window_bounds = array<i64: 1, 32, 256>}]} {
    %c0 = arith.constant 0 : index
    %c0_0 = arith.constant 0 : index
    %c0_1 = arith.constant 0 : index
    %0 = vector.load %arg2[%c0, %c0_0, %c0_1] : memref<1x4x256xf32, #tpu.memory_space<vmem>>, vector<1x4x256xf32>
    %1 = vector.shape_cast %0 : vector<1x4x256xf32> to vector<4x256xf32>
    %2 = vector.extract_strided_slice %1 {offsets = [3, 0], sizes = [1, 256], strides = [1, 1]} : vector<4x256xf32> to vector<1x256xf32>
    %3 = vector.extract_strided_slice %1 {offsets = [0, 0], sizes = [3, 256], strides = [1, 1]} : vector<4x256xf32> to vector<3x256xf32>
    %4 = vector.broadcast %2 : vector<1x256xf32> to vector<3x256xf32>
    %5 = arith.mulf %3, %4 : vector<3x256xf32>
    %c0_2 = arith.constant 0 : index
    %c0_3 = arith.constant 0 : index
    %c0_4 = arith.constant 0 : index
    %6 = vector.load %arg3[%c0_2, %c0_3, %c0_4] : memref<1x4x256xi32, #tpu.memory_space<vmem>>, vector<1x4x256xi32>
    %7 = vector.shape_cast %6 : vector<1x4x256xi32> to vector<4x256xi32>
    %8 = tpu.iota {dimensions = array<i32: 0>} : vector<20x256xi32>
    %cst = arith.constant 0.000000e+00 : f32
    %9 = vector.broadcast %cst : f32 to vector<20x256xf32>
    %10 = vector.extract_strided_slice %7 {offsets = [0, 0], sizes = [1, 256], strides = [1, 1]} : vector<4x256xi32> to vector<1x256xi32>
    %11 = vector.broadcast %10 : vector<1x256xi32> to vector<20x256xi32>
    %12 = arith.cmpi eq, %11, %8 : vector<20x256xi32>
    %cst_5 = arith.constant 0.000000e+00 : f32
    %13 = vector.shape_cast %2 : vector<1x256xf32> to vector<1x256xf32>
    %14 = vector.broadcast %13 : vector<1x256xf32> to vector<20x256xf32>
    %15 = vector.broadcast %cst_5 : f32 to vector<20x256xf32>
    %16 = arith.select %12, %14, %15 : vector<20x256xi1>, vector<20x256xf32>
    %17 = arith.addf %9, %16 : vector<20x256xf32>
    %18 = vector.extract_strided_slice %7 {offsets = [1, 0], sizes = [1, 256], strides = [1, 1]} : vector<4x256xi32> to vector<1x256xi32>
    %19 = vector.broadcast %18 : vector<1x256xi32> to vector<20x256xi32>
    %20 = arith.cmpi eq, %19, %8 : vector<20x256xi32>
    %cst_6 = arith.constant 0.000000e+00 : f32
    %21 = vector.shape_cast %2 : vector<1x256xf32> to vector<1x256xf32>
    %22 = vector.broadcast %21 : vector<1x256xf32> to vector<20x256xf32>
    %23 = vector.broadcast %cst_6 : f32 to vector<20x256xf32>
    %24 = arith.select %20, %22, %23 : vector<20x256xi1>, vector<20x256xf32>
    %25 = arith.addf %17, %24 : vector<20x256xf32>
    %26 = vector.extract_strided_slice %7 {offsets = [2, 0], sizes = [1, 256], strides = [1, 1]} : vector<4x256xi32> to vector<1x256xi32>
    %27 = vector.broadcast %26 : vector<1x256xi32> to vector<20x256xi32>
    %28 = arith.cmpi eq, %27, %8 : vector<20x256xi32>
    %cst_7 = arith.constant 0.000000e+00 : f32
    %29 = vector.shape_cast %2 : vector<1x256xf32> to vector<1x256xf32>
    %30 = vector.broadcast %29 : vector<1x256xf32> to vector<20x256xf32>
    %31 = vector.broadcast %cst_7 : f32 to vector<20x256xf32>
    %32 = arith.select %28, %30, %31 : vector<20x256xi1>, vector<20x256xf32>
    %33 = arith.addf %25, %32 : vector<20x256xf32>
    %34 = vector.extract_strided_slice %7 {offsets = [3, 0], sizes = [1, 256], strides = [1, 1]} : vector<4x256xi32> to vector<1x256xi32>
    %35 = vector.broadcast %34 : vector<1x256xi32> to vector<20x256xi32>
    %36 = arith.cmpi eq, %35, %8 : vector<20x256xi32>
    %cst_8 = arith.constant 0.000000e+00 : f32
    %37 = vector.shape_cast %2 : vector<1x256xf32> to vector<1x256xf32>
    %38 = vector.broadcast %37 : vector<1x256xf32> to vector<20x256xf32>
    %39 = vector.broadcast %cst_8 : f32 to vector<20x256xf32>
    %40 = arith.select %36, %38, %39 : vector<20x256xi1>, vector<20x256xf32>
    %41 = arith.addf %33, %40 : vector<20x256xf32>
    %c0_9 = arith.constant 0 : index
    %c0_10 = arith.constant 0 : index
    %42 = vector.load %arg4[%c0_9, %c0_10] : memref<32x3xf32, #tpu.memory_space<vmem>>, vector<32x3xf32>
    %cst_11 = arith.constant dense<0.000000e+00> : vector<32x256xf32>
    %43 = tpu.matmul %42, %5, %cst_11 {dimension_numbers = #tpu.dot_dimension_numbers<[1], [0], [0], [1], [0, 0, 1, 1], [], []>} : vector<32x3xf32>, vector<3x256xf32>, vector<32x256xf32> -> vector<32x256xf32>
    %c0_12 = arith.constant 0 : index
    %c0_13 = arith.constant 0 : index
    %44 = vector.load %arg5[%c0_12, %c0_13] : memref<32x1xf32, #tpu.memory_space<vmem>>, vector<32x1xf32>
    %45 = vector.broadcast %44 : vector<32x1xf32> to vector<32x256xf32>
    %46 = arith.addf %43, %45 : vector<32x256xf32>
    %cst_14 = arith.constant 0.000000e+00 : f32
    %47 = vector.broadcast %cst_14 : f32 to vector<32x256xf32>
    %48 = arith.cmpf ogt, %46, %47 : vector<32x256xf32>
    %cst_15 = arith.constant 0.00999999977 : f32
    %49 = vector.broadcast %cst_15 : f32 to vector<32x256xf32>
    %50 = arith.mulf %49, %46 : vector<32x256xf32>
    %51 = arith.select %48, %46, %50 : vector<32x256xi1>, vector<32x256xf32>
    %c0_16 = arith.constant 0 : index
    %c0_17 = arith.constant 0 : index
    %52 = vector.load %arg6[%c0_16, %c0_17] : memref<32x20xf32, #tpu.memory_space<vmem>>, vector<32x20xf32>
    %cst_18 = arith.constant dense<0.000000e+00> : vector<32x256xf32>
    %53 = tpu.matmul %52, %41, %cst_18 {dimension_numbers = #tpu.dot_dimension_numbers<[1], [0], [0], [1], [0, 0, 1, 1], [], []>} : vector<32x20xf32>, vector<20x256xf32>, vector<32x256xf32> -> vector<32x256xf32>
    %c0_19 = arith.constant 0 : index
    %c0_20 = arith.constant 0 : index
    %54 = vector.load %arg7[%c0_19, %c0_20] : memref<32x1xf32, #tpu.memory_space<vmem>>, vector<32x1xf32>
    %55 = vector.broadcast %54 : vector<32x1xf32> to vector<32x256xf32>
    %56 = arith.addf %53, %55 : vector<32x256xf32>
    %cst_21 = arith.constant 0.000000e+00 : f32
    %57 = vector.broadcast %cst_21 : f32 to vector<32x256xf32>
    %58 = arith.cmpf ogt, %56, %57 : vector<32x256xf32>
    %cst_22 = arith.constant 0.00999999977 : f32
    %59 = vector.broadcast %cst_22 : f32 to vector<32x256xf32>
    %60 = arith.mulf %59, %56 : vector<32x256xf32>
    %61 = arith.select %58, %56, %60 : vector<32x256xi1>, vector<32x256xf32>
    %c0_23 = arith.constant 0 : index
    %c0_24 = arith.constant 0 : index
    %62 = vector.load %arg8[%c0_23, %c0_24] : memref<32x32xf32, #tpu.memory_space<vmem>>, vector<32x32xf32>
    %cst_25 = arith.constant dense<0.000000e+00> : vector<32x256xf32>
    %63 = tpu.matmul %62, %51, %cst_25 {dimension_numbers = #tpu.dot_dimension_numbers<[1], [0], [0], [1], [0, 0, 1, 1], [], []>} : vector<32x32xf32>, vector<32x256xf32>, vector<32x256xf32> -> vector<32x256xf32>
    %c0_26 = arith.constant 0 : index
    %c0_27 = arith.constant 0 : index
    %64 = vector.load %arg9[%c0_26, %c0_27] : memref<32x32xf32, #tpu.memory_space<vmem>>, vector<32x32xf32>
    %cst_28 = arith.constant dense<0.000000e+00> : vector<32x256xf32>
    %65 = tpu.matmul %64, %61, %cst_28 {dimension_numbers = #tpu.dot_dimension_numbers<[1], [0], [0], [1], [0, 0, 1, 1], [], []>} : vector<32x32xf32>, vector<32x256xf32>, vector<32x256xf32> -> vector<32x256xf32>
    %66 = arith.addf %63, %65 : vector<32x256xf32>
    %c0_29 = arith.constant 0 : index
    %c0_30 = arith.constant 0 : index
    %67 = vector.load %arg10[%c0_29, %c0_30] : memref<32x1xf32, #tpu.memory_space<vmem>>, vector<32x1xf32>
    %68 = vector.broadcast %67 : vector<32x1xf32> to vector<32x256xf32>
    %69 = arith.addf %66, %68 : vector<32x256xf32>
    %70 = arith.truncf %69 : vector<32x256xf32> to vector<32x256xbf16>
    %c0_31 = arith.constant 0 : index
    %c0_32 = arith.constant 0 : index
    %c0_33 = arith.constant 0 : index
    %71 = vector.load %arg11[%c0_31, %c0_32, %c0_33] : memref<1x32x256xbf16, #tpu.memory_space<vmem>>, vector<1x32x256xbf16>
    %72 = vector.shape_cast %71 : vector<1x32x256xbf16> to vector<32x256xbf16>
    %73 = vector.shape_cast %70 : vector<32x256xbf16> to vector<1x32x256xbf16>
    tpu.vector_store %arg11[%c0_31, %c0_32, %c0_33], %73 {strides = array<i32>} : memref<1x32x256xbf16, #tpu.memory_space<vmem>>, vector<1x32x256xbf16>,
    return
  }
  func.func @transform_0(%arg0: i32, %arg1: i32) -> (i32, i32, i32) {
    %c0_i32 = arith.constant 0 : i32
    %c0_i32_0 = arith.constant 0 : i32
    return %arg0, %c0_i32, %arg1 : i32, i32, i32
  }
  func.func @transform_1(%arg0: i32, %arg1: i32) -> (i32, i32, i32) {
    %c0_i32 = arith.constant 0 : i32
    %c0_i32_0 = arith.constant 0 : i32
    return %arg0, %c0_i32, %arg1 : i32, i32, i32
  }
  func.func @transform_2(%arg0: i32, %arg1: i32) -> (i32, i32) {
    %c0_i32 = arith.constant 0 : i32
    %c0_i32_0 = arith.constant 0 : i32
    %c0_i32_1 = arith.constant 0 : i32
    return %c0_i32, %c0_i32_0 : i32, i32
  }
  func.func @transform_3(%arg0: i32, %arg1: i32) -> (i32, i32) {
    %c0_i32 = arith.constant 0 : i32
    %c0_i32_0 = arith.constant 0 : i32
    %c0_i32_1 = arith.constant 0 : i32
    return %c0_i32, %c0_i32_0 : i32, i32
  }
  func.func @transform_4(%arg0: i32, %arg1: i32) -> (i32, i32) {
    %c0_i32 = arith.constant 0 : i32
    %c0_i32_0 = arith.constant 0 : i32
    %c0_i32_1 = arith.constant 0 : i32
    return %c0_i32, %c0_i32_0 : i32, i32
  }
  func.func @transform_5(%arg0: i32, %arg1: i32) -> (i32, i32) {
    %c0_i32 = arith.constant 0 : i32
    %c0_i32_0 = arith.constant 0 : i32
    %c0_i32_1 = arith.constant 0 : i32
    return %c0_i32, %c0_i32_0 : i32, i32
  }
  func.func @transform_6(%arg0: i32, %arg1: i32) -> (i32, i32) {
    %c0_i32 = arith.constant 0 : i32
    %c0_i32_0 = arith.constant 0 : i32
    %c0_i32_1 = arith.constant 0 : i32
    return %c0_i32, %c0_i32_0 : i32, i32
  }
  func.func @transform_7(%arg0: i32, %arg1: i32) -> (i32, i32) {
    %c0_i32 = arith.constant 0 : i32
    %c0_i32_0 = arith.constant 0 : i32
    %c0_i32_1 = arith.constant 0 : i32
    return %c0_i32, %c0_i32_0 : i32, i32
  }
  func.func @transform_8(%arg0: i32, %arg1: i32) -> (i32, i32) {
    %c0_i32 = arith.constant 0 : i32
    %c0_i32_0 = arith.constant 0 : i32
    %c0_i32_1 = arith.constant 0 : i32
    return %c0_i32, %c0_i32_0 : i32, i32
  }
  func.func @transform_9(%arg0: i32, %arg1: i32) -> (i32, i32, i32) {
    %c0_i32 = arith.constant 0 : i32
    %c0_i32_0 = arith.constant 0 : i32
    return %arg0, %c0_i32, %arg1 : i32, i32, i32
  }
}

</mosaic_0001>

<bundles_post_ra>
// kernel: tpu_custom_call.1
= control target key start
LH: loop header
LB: loop body
LE: loop exit
PB: predicated region body
PF: predicated region fallthrough
CT: control target
= control target key end

     0   :  { %14 = vsyncpa [#allocation3], 0  ;;  %s1909_s0 = inlined_call_operand.vmem [shape: f32[4,4,256], index: 0, kind: input, shape index: {}]   ;;  %s1910_s1 = inlined_call_operand.vmem [shape: s32[4,4,256], index: 1, kind: input, shape index: {}]   ;;  %s1911_s2 = inlined_call_operand.vmem [shape: f32[32,3], index: 2, kind: input, shape index: {}]   ;;  %s1912_s3 = inlined_call_operand.vmem [shape: f32[32,1], index: 3, kind: input, shape index: {}]   ;;  %s1913_s4 = inlined_call_operand.vmem [shape: f32[32,20], index: 4, kind: input, shape index: {}]   ;;  %s1914_s5 = inlined_call_operand.vmem [shape: f32[32,1], index: 5, kind: input, shape index: {}]   ;;  %s1915_s6 = inlined_call_operand.vmem [shape: f32[32,32], index: 6, kind: input, shape index: {}]   ;;  %s1916_s7 = inlined_call_operand.vmem [shape: f32[32,32], index: 7, kind: input, shape index: {}]   ;;  %s1917_s8 = inlined_call_operand.vmem [shape: f32[32,1], index: 8, kind: input, shape index: {}]   ;;  %s1918_s9 = inlined_call_operand.hbm [shape: bf16[4,32,256], index: 9, kind: output, shape index: {}]  }
   0x1   :  { %16 = vsyncpa [#allocation3 + $0x1], 0  ;;  %s1540_s30 = smov 0   ;;  %s1542_s10 = smov 0  }
   0x2   :  { %s1544_s11 = smov 0   ;;  %s1546_s12 = smov 0  }
   0x3   :  { %s1548_s13 = smov 0   ;;  %s1550_s14 = smov 0  }
   0x4 LB: > { %s1270_s15 = sadd.s32 4294967295, %s1483_s14   ;;  %s1271_s16 = sadd.s32 4294967294, %s1483_s14   ;;  %s1483_s14 = sphi %s1550_s14, %s22_s14   ;;  %s1479_s13 = sphi %s1548_s13, %s1925_s13   ;;  %s1475_s12 = sphi %s1546_s12, %s1924_s12   ;;  %s1471_s11 = sphi %s1544_s11, %s1923_s11   ;;  %s1467_s10 = sphi %s1542_s10, %s1922_s10   ;;  %s1463_s30 = sphi %s1540_s30, %s1921_s30  }
   0x5   : > { %s34_s17 = sadd.s32 1, %s1479_s13  ;;  %s246_s18 = sadd.s32 1, %s1471_s11 }
   0x6   : > { %p36_p0 = scmp.ge.s32.totalorder %s34_s17, 4  ;;  %p256_p1 = scmp.ne.s32.totalorder %s1471_s11, %s1467_s10 }
   0x7   : > { %p257_p2 = scmp.eq.s32.totalorder %s1270_s15, 3  ;;  %p262_p3 = scmp.ne.s32.totalorder %s1467_s10, %s1463_s30 }
   0x8   : > { %s1927_s17 = smov (%p36_p0, %s34_s17), 0  ;;  %p263_p5 = scmp.eq.s32.totalorder %s1271_s16, 3 }
   0x9   : > { %p1580_p4 = por %p257_p2, %p256_p1  ;;  %s241_s20 = ssub.s32 %s1479_s13, %s1927_s17 }
   0xa   : > { %p1274_p6 = scmp.ge.s32.totalorder %s1483_s14, 1  ;;  %p244_p7 = scmp.eq.s32.totalorder %s241_s20, 0 }
   0xb   : > { %p1587_p8 = por %p263_p5, %p262_p3  ;;  %p328_p9 = scmp.lt.s32.totalorder %s1483_s14, 5 }
   0xc   : > { %s1593_s22 = scalar_select %p244_p7, %s1471_s11, %s246_s18  }
   0xd   : > { %p329_p10 = pnand %p1274_p6, %p328_p9 }
   0xe   : > { %p378_p11 = scmp.lt.s32.totalorder (!%p329_p10), %s1475_s12, 3  ;;  %v400_v0 = vlaneseq (!%p329_p10)  ;;  %v1485_v1 = vmov (!%p329_p10), 0.0   ;;  %v1486_v3 = vmov (!%p329_p10), 0   ;;  %v729_v4 = vld [vmem:[%s1914_s5] sm:$0xff] (!%p329_p10)  ;;  %v730_v13 = vld [vmem:[%s1914_s5 + $0x8] sm:$0xff] (!%p329_p10)  ;;  %vm607_vm0 = vcmask (!%p329_p10), 1042432  }
   0xf   : > { %332 = sbr.rel (%p329_p10) target bundleno = 538 (0x21a), region = 56  ;;  %676 = vmatprep.mubr.f32.mxu0 (!%p329_p10), %v1485_v1  ;;  %837 = vmatprep.mubr.f32.mxu1 (!%p329_p10), %v1485_v1  ;;  %v568_v5 = vld [vmem:[%s1912_s3] sm:$0xff] (!%p329_p10)  ;;  %v569_v19 = vld [vmem:[%s1912_s3 + $0x8] sm:$0xff] (!%p329_p10)  ;;  %vm594_vm1 = vcmask (!%p329_p10), 23552   ;;  %v571_v32 = vld [vmem:[%s1912_s3 + $0x18] sm:$0xff] (!%p329_p10)  ;;  %s374_s18 = sand.u32 (!%p329_p10), 1, %s1467_s10  }
  0x10   : > { %v1599_v2 = vshrl.u32 (!%p329_p10), %v400_v0, 7  ;;  %1404 = vset.pattern.permute.xlu1 (!%p329_p10), %v1486_v3  ;;  %1403 = vset.pattern.permute.xlu0 (!%p329_p10), %v1486_v3  ;;  %v570_v37 = vld [vmem:[%s1912_s3 + $0x10] sm:$0xff] (!%p329_p10)  ;;  %v732_v45 = vld [vmem:[%s1914_s5 + $0x18] sm:$0xff] (!%p329_p10)  ;;  %v564_v52 = vld [vmem:[%s1911_s2] sm:$0xff] (!%p329_p10)  ;;  %s1275_s20 = sshll.u32 (!%p329_p10), %s374_s18, 5  ;;  %s1315_s25 = sshll.u32 (!%p329_p10), %s1475_s12, 9 }
  0x11   : > { %735 = vperm.xlu1 (!%p329_p10), %1404, %v729_v4   ;;  %574 = vperm.xlu0 (!%p329_p10), %1403, %v568_v5   ;;  %v731_v48 = vld [vmem:[%s1914_s5 + $0x10] sm:$0xff] (!%p329_p10)  ;;  %v1098_v61 = vld [vmem:[%s1917_s8 + $0x8] sm:$0xff] (!%p329_p10)  ;;  %v1097_v62 = vld [vmem:[%s1917_s8] sm:$0xff] (!%p329_p10)  ;;  %s1863_s29 = scalar_lea.sflag (!%p329_p10), [#allocation3], %s374_s18 }
  0x12   : > { %v1608_v6 = vsub.s32 (!%p329_p10), 3, %v1599_v2  ;;  %v406_v7 = vsub.s32 (!%p329_p10), 7, %v1599_v2  ;;  %v430_v8 = vsub.s32 (!%p329_p10), 0, %v1599_v2  ;;  %v1619_v9 = vadd.s32 (!%p329_p10), 8, %v1599_v2 }
  0x13   : > { %v434_v10 = vsub.s32 (!%p329_p10), 4, %v1599_v2  ;;  %v464_v11 = vsub.s32 (!%p329_p10), 1, %v1599_v2  ;;  %v468_v12 = vsub.s32 (!%p329_p10), 5, %v1599_v2  ;;  %v1630_v16 = vsub.s32 (!%p329_p10), 2, %v1599_v2 }
  0x14   : > { %v502_v17 = vsub.s32 (!%p329_p10), 6, %v1599_v2  ;;  %v1634_v18 = vadd.s32 (!%p329_p10), 16, %v1599_v2 }
  0x15   : > { %740 = vperm.xlu1 (!%p329_p10), %1404, %v730_v13   ;;  %579 = vperm.xlu0 (!%p329_p10), %1403, %v569_v19  }
  0x16   : > { %s379_s23 = scalar_select %p378_p11, %s1475_s12, 3 }
  0x17   : > { %s1487_s12 = smov [#allocation2]  }
  0x18   : > { %s1309_s28 = sshll.u32 %s379_s23, 3 }
  0x19   : > { %s385_s16 = scalar_lea.vmem %s1909_s0, %s1309_s28  ;;  %s395_s24 = scalar_lea.vmem %s1910_s1, %s1309_s28  ;;  %589 = vperm.xlu1 %1404, %v571_v32   ;;  %584 = vperm.xlu0 %1403, %v570_v37  }
  0x1a   : > { %v398_v14 = vld [vmem:[%s385_s16] sm:$0xff]  ;;  %s1859_s28 = scalar_lea.hbm %s1918_s9, %s1315_s25  ;;  %s1409_s16 = sshll.u32 %s1487_s12, 4  ;;  %s1410_s16 = int_to_ptr.vmem [resolvable:$false] %s1409_s16 }
  0x1b   : > { %v1627_v15 = vld [vmem:[%s395_s24] sm:$0xff]  ;;  %v403_v20 = vrot.slane %v398_v14, %v1608_v6  ;;  %v407_v21 = vrot.slane %v398_v14, %v406_v7  ;;  %s376_s24 = scalar_lea.vmem [#allocation2], %s1275_s20  ;;  %s1411_s20 = scalar_lea.vmem %s1410_s16, 1024 }
  0x1c   : > { %v435_v22 = vrot.slane %v1627_v15, %v434_v10  ;;  %v469_v23 = vrot.slane %v1627_v15, %v468_v12  ;;  %v503_v24 = vrot.slane %v1627_v15, %v502_v17  ;;  %v537_v25 = vrot.slane %v1627_v15, %v406_v7  ;;  %s1173_s23 = sshll.u32 %s376_s24, 4  ;;  %s1854_s23 = int_to_ptr.vmem [resolvable:$true] %s1173_s23 }
  0x1d   : > { %v431_v26 = vrot.slane %v1627_v15, %v430_v8  ;;  %v465_v27 = vrot.slane %v1627_v15, %v464_v11  ;;  %v1647_v28 = vrot.slane %v403_v20, %v1608_v6  ;;  %v1650_v29 = vrot.slane %v407_v21, %v1608_v6  ;;  %750 = vperm.xlu1 %1404, %v732_v45   ;;  %v566_v21 = vld [vmem:[%s1911_s2 + $0x10] sm:$0xff]  ;;  %s1405_s15 = scalar_lea.vmem %s1854_s23, 512  ;;  %p1412_p1 = scmp.lt.s32.totalorder %s1854_s23, %s1410_s16 }
  0x1e   : > { %v1652_v30 = vrot.slane %v435_v22, %v430_v8  ;;  %v1654_v31 = vrot.slane %v469_v23, %v464_v11  ;;  %v1660_v33 = vrot.slane %v503_v24, %v1630_v16  ;;  %v1663_v34 = vrot.slane %v537_v25, %v1608_v6  ;;  %745 = vperm.xlu0 %1403, %v731_v48   ;;  %p1406_p12 = scmp.ne.s32.totalorder %s1854_s23, %s1405_s15  ;;  %p1413_p2 = scmp.lt.s32.totalorder %s1411_s20, %s1405_s15 }
  0x1f   : > { %v1665_v35 = vrot.slane %v431_v26, %v430_v8  ;;  %v1667_v36 = vrot.slane %v465_v27, %v464_v11  ;;  %v420_v38 = vcombine.low %v1647_v28, %v1650_v29  ;;  %v499_v3 = vrot.slane %v1627_v15, %v1630_v16  ;;  %v565_v8 = vld [vmem:[%s1911_s2 + $0x8] sm:$0xff] }
  0x20   : > { %vm445_vm2 = vcmp.eq.s32.totalorder %v1652_v30, %v1599_v2  ;;  %vm447_vm3 = vcmp.eq.s32.totalorder %v1652_v30, %v1619_v9  ;;  %vm479_vm4 = vcmp.eq.s32.totalorder %v1654_v31, %v1599_v2  ;;  %vm481_vm5 = vcmp.eq.s32.totalorder %v1654_v31, %v1619_v9  ;;  %p1407_p13 = pnand %p1406_p12, %p1580_p4  ;;  %p1414_p3 = por %p1413_p2, %p1412_p1 }
  0x21   : > { %v451_v39 = vsel %vm445_vm2, %v1650_v29, 0.0  ;;  %v453_v40 = vsel %vm447_vm3, %v1650_v29, 0.0  ;;  %v485_v41 = vsel %vm479_vm4, %v1650_v29, 0.0  ;;  %v422_v42 = vmul.f32 %v420_v38, %v398_v14  ;;  %1108 = vperm.xlu1 %1404, %v1098_v61   ;;  %v727_v38 = vld [vmem:[%s1913_s4 + $0x10] sm:$0xff] }
  0x22   : > { %v487_v43 = vsel %vm481_vm5, %v1650_v29, 0.0  ;;  %v491_v44 = vadd.f32 %v485_v41, %v451_v39  ;;  %vm513_vm6 = vcmp.eq.s32.totalorder %v1660_v33, %v1599_v2  ;;  %vm515_vm7 = vcmp.eq.s32.totalorder %v1660_v33, %v1619_v9  ;;  %1103 = vperm.xlu0 %1403, %v1097_v62   ;;  %v728_v39 = vld [vmem:[%s1913_s4 + $0x18] sm:$0xff]  ;;  %p1408_p0 = pneg %p1407_p13 }
  0x23   : > { %v493_v46 = vadd.f32 %v487_v43, %v453_v40  ;;  %v519_v47 = vsel %vm513_vm6, %v1650_v29, 0.0  ;;  %vm547_vm8 = vcmp.eq.s32.totalorder %v1663_v34, %v1599_v2  ;;  %v593_v49 = vcombine.high %v422_v42, %v422_v42 }
  0x24   : > { %v521_v50 = vsel %vm515_vm7, %v1650_v29, 0.0  ;;  %v525_v51 = vadd.f32 %v519_v47, %v491_v44  ;;  %vm549_vm9 = vcmp.eq.s32.totalorder %v1663_v34, %v1619_v9  ;;  %v553_v54 = vsel %vm547_vm8, %v1650_v29, 0.0  ;;  %p1415_p5 = pnand %p1414_p3, %p1408_p0 }
  0x25   : > { %v527_v53 = vadd.f32 %v521_v50, %v493_v46  ;;  %v555_v55 = vsel %vm549_vm9, %v1650_v29, 0.0  ;;  %vm444_vm10 = vcmp.eq.s32.totalorder %v1665_v35, %v1599_v2  ;;  %1280 = vmatprep.subr.msk.mxu0 %vm607_vm0, %v593_v49  ;;  %vm446_vm11 = vcmp.eq.s32.totalorder %v1665_v35, %v1619_v9 }
  0x26   : > { %v559_v56 = vadd.f32 %v553_v54, %v525_v51  ;;  %v450_v57 = vsel %vm444_vm10, %v1647_v28, 0.0  ;;  %vm478_vm12 = vcmp.eq.s32.totalorder %v1667_v36, %v1599_v2  ;;  %1281 = vmatpush1.msk.msra.mxu0 %vm607_vm0, %v422_v42  ;;  %v452_v59 = vsel %vm446_vm11, %v1647_v28, 0.0 }
  0x27   : > { %v561_v58 = vadd.f32 %v555_v55, %v527_v53  ;;  %vm480_vm13 = vcmp.eq.s32.totalorder %v1667_v36, %v1619_v9  ;;  %v484_v60 = vsel %vm478_vm12, %v1647_v28, 0.0  ;;  %1282 = vmatmul.mubr.msk.f32.vlgmr.msra.gmra.mrb[0].mxu0 %vm594_vm1, %v564_v52  ;;  %v533_v4 = vrot.slane %v1627_v15, %v1608_v6  ;;  %v1099_v15 = vld [vmem:[%s1917_s8 + $0x10] sm:$0xff] }
  0x28   : > { %v486_v63 = vsel %vm480_vm13, %v1647_v28, 0.0  ;;  %v490_v0 = vadd.f32 %v484_v60, %v450_v57  ;;  %682 = vmatprep.mubr.f32.mxu0 %v1485_v1  ;;  %vm449_vm14 = vcmp.eq.s32.totalorder %v1652_v30, %v1634_v18  ;;  %vm483_vm15 = vcmp.eq.s32.totalorder %v1654_v31, %v1634_v18  ;;  %1113 = vperm.xlu0 %1403, %v1099_v15  }
  0x29   : > { %v1316_v5 = vpack.c.bf16 %v561_v58, %v559_v56  ;;  %v492_v7 = vadd.f32 %v486_v63, %v452_v59  ;;  %v507_v10 = vrot.slane %v499_v3, %v1630_v16  ;;  %v541_v11 = vrot.slane %v533_v4, %v1608_v6  ;;  %v1100_v6 = vld [vmem:[%s1917_s8 + $0x18] sm:$0xff] }
  0x2a   : > { %v455_v12 = vsel %vm449_vm14, %v1650_v29, 0.0  ;;  %v489_v13 = vsel %vm483_vm15, %v1650_v29, 0.0  ;;  %vm517_vm0 = vcmp.eq.s32.totalorder %v1660_v33, %v1634_v18  ;;  %vm551_vm2 = vcmp.eq.s32.totalorder %v1663_v34, %v1634_v18  ;;  %1118 = vperm.xlu1 %1404, %v1100_v6   ;;  %v567_v33 = vld [vmem:[%s1911_s2 + $0x18] sm:$0xff] }
  0x2b   : > { %1317 = vmatprep.subr.bf16.mxu1 %v1316_v5  ;;  %v495_v14 = vadd.f32 %v489_v13, %v455_v12  ;;  %vm448_vm3 = vcmp.eq.s32.totalorder %v1665_v35, %v1634_v18  ;;  %vm512_vm4 = vcmp.eq.s32.totalorder %v507_v10, %v1599_v2  ;;  %vm514_vm5 = vcmp.eq.s32.totalorder %v507_v10, %v1619_v9 }
  0x2c   : > { %vm546_vm6 = vcmp.eq.s32.totalorder %v541_v11, %v1599_v2  ;;  %vm548_vm7 = vcmp.eq.s32.totalorder %v541_v11, %v1619_v9  ;;  %1283 = vmatmul.mubr.msk.f32.gmra.mrb[2].mxu0 %vm594_vm1, %v565_v8  ;;  %v518_v16 = vsel %vm512_vm4, %v1647_v28, 0.0  ;;  %v520_v17 = vsel %vm514_vm5, %v1647_v28, 0.0 }
  0x2d   : > { %v552_v19 = vsel %vm546_vm6, %v1647_v28, 0.0  ;;  %v554_v20 = vsel %vm548_vm7, %v1647_v28, 0.0  ;;  %688 = vmatprep.mubr.f32.mxu0 %v1485_v1  ;;  %v524_v22 = vadd.f32 %v518_v16, %v490_v0  ;;  %v526_v2 = vadd.f32 %v520_v17, %v492_v7 }
  0x2e   : > { %v523_v9 = vsel %vm517_vm0, %v1650_v29, 0.0  ;;  %v557_v23 = vsel %vm551_vm2, %v1650_v29, 0.0  ;;  %v454_v25 = vsel %vm448_vm3, %v1647_v28, 0.0  ;;  %vm482_vm8 = vcmp.eq.s32.totalorder %v1667_v36, %v1634_v18 }
  0x2f   : > { %v529_v24 = vadd.f32 %v523_v9, %v495_v14  ;;  %vm516_vm9 = vcmp.eq.s32.totalorder %v507_v10, %v1634_v18  ;;  %v558_v26 = vadd.f32 %v552_v19, %v524_v22  ;;  %v560_v27 = vadd.f32 %v554_v20, %v526_v2 }
  0x30   : > { %v488_v30 = vsel %vm482_vm8, %v1647_v28, 0.0  ;;  %v522_v31 = vsel %vm516_vm9, %v1647_v28, 0.0  ;;  %1284 = vmatmul.mubr.msk.f32.gmra.mrb[4].mxu0 %vm594_vm1, %v566_v21  ;;  %vm550_vm10 = vcmp.eq.s32.totalorder %v541_v11, %v1634_v18  ;;  %vm766_vm11 = vcmask 1043456   ;;  %v725_v18 = vld [vmem:[%s1913_s4] sm:$0xff] }
  0x31   : > { %v563_v29 = vadd.f32 %v557_v23, %v529_v24  ;;  %v494_v32 = vadd.f32 %v488_v30, %v454_v25  ;;  %694 = vmatprep.mubr.f32.mxu0 %v1485_v1  ;;  %v1318_v34 = vpack.c.bf16 %v560_v27, %v558_v26  ;;  %v556_v35 = vsel %vm550_vm10, %v1647_v28, 0.0  ;;  %v726_v28 = vld [vmem:[%s1913_s4 + $0x8] sm:$0xff]  ;;  %v886_v30 = vld [vmem:[%s1915_s6] sm:$0xff] }
  0x32   : > { %vm753_vm12 = vcmask 162816   ;;  %vm894_vm5 = vcmask 261120  }
  0x33   : > { %v528_v36 = vadd.f32 %v522_v31, %v494_v32  ;;  %1319 = vmatpush1.bf16.msra.mxu1 %v1318_v34 }
  0x34   : > { %1285 = vmatmul.mubr.msk.f32.gmra.mrb[6].mxu0 %vm594_vm1, %v567_v33  ;;  %1286 = vmatprep.subr.msk.mxu1 %vm766_vm11, %v563_v29 }
  0x35   : > { %v562_v37 = vadd.f32 %v556_v35, %v528_v36  ;;  %1072 = vmatprep.mubr.f32.mxu0 %v1485_v1 }
  0x37   : > { %1287 = vmatpush1.msk.msra.mxu1 %vm766_vm11, %v562_v37 }
  0x38   : > { %1288 = vmatmul.mubr.msk.f32.vlgmr.msra.gmra.mrb[0].mxu1 %vm753_vm12, %v725_v18 }
  0x39   : > { %843 = vmatprep.mubr.f32.mxu1 %v1485_v1 }
  0x3c   : > { %1289 = vmatmul.mubr.msk.f32.gmra.mrb[2].mxu1 %vm753_vm12, %v726_v28 }
  0x3d   : > { %849 = vmatprep.mubr.f32.mxu1 %v1485_v1 }
  0x40   : > { %1290 = vmatmul.mubr.msk.f32.gmra.mrb[4].mxu1 %vm753_vm12, %v727_v38  ;;  %v887_v38 = vld [vmem:[%s1915_s6 + $0x8] sm:$0xff] }
  0x41   : > { %855 = vmatprep.mubr.f32.mxu1 %v1485_v1 }
  0x44   : > { %1291 = vmatmul.mubr.msk.f32.gmra.mrb[6].mxu1 %vm753_vm12, %v728_v39 }
  0x45   : > { %971 = vmatprep.mubr.f32.mxu1 %v1485_v1 }
  0x90   : > { %v575_v40 = vpop.permute.xlu0 %574  ;;  %v736_v41 = vpop.permute.xlu1 %735 }
  0x94   : > { %v580_v45 = vpop.permute.xlu0 %579  ;;  %v741_v52 = vpop.permute.xlu1 %740 }
  0x98   : > { %v585_v56 = vpop.permute.xlu0 %584  ;;  %v590_v5 = vpop.permute.xlu1 %589 }
  0x9d   : > { %v746_v33 = vpop.permute.xlu0 %745 }
  0xfa   : > { %v678_v42 = vpop.f32.mrb[0].mxu0 }
  0xfb   : > { %v679_v43 = vadd.f32 %v678_v42, %v575_v40  ;;  %v680_v44 = vpop.f32.mrb[1].mxu0 }
  0xfc   : > { %v681_v46 = vadd.f32 %v680_v44, %v575_v40  ;;  %v751_v44 = vpop.permute.xlu1 %750 }
  0xfd   : > { %v709_v47 = vmul.f32 0.01, %v679_v43  ;;  %vm701_vm1 = vcmp.gt.f32.partialorder %v679_v43, 0.0 }
  0xfe   : > { %v710_v48 = vmul.f32 0.01, %v681_v46  ;;  %vm702_vm13 = vcmp.gt.f32.partialorder %v681_v46, 0.0 }
  0xff   : > { %v684_v49 = vpop.f32.mrb[2].mxu0  ;;  %v717_v54 = vsel %vm701_vm1, %v679_v43, %v709_v47 }
 0x100   : > { %v685_v50 = vadd.f32 %v684_v49, %v580_v45  ;;  %v686_v51 = vpop.f32.mrb[3].mxu0  ;;  %v718_v59 = vsel %vm702_vm13, %v681_v46, %v710_v48  ;;  %v888_v49 = vld [vmem:[%s1915_s6 + $0x10] sm:$0xff] }
 0x101   : > { %v687_v53 = vadd.f32 %v686_v51, %v580_v45 }
 0x102   : > { %vm703_vm14 = vcmp.gt.f32.partialorder %v685_v50, 0.0  ;;  %v711_v55 = vmul.f32 0.01, %v685_v50 }
 0x103   : > { %vm704_vm15 = vcmp.gt.f32.partialorder %v687_v53, 0.0  ;;  %v712_v57 = vmul.f32 0.01, %v687_v53  ;;  %v690_v58 = vpop.f32.mrb[4].mxu0 }
 0x104   : > { %v719_v60 = vsel %vm703_vm14, %v685_v50, %v711_v55  ;;  %v691_v61 = vadd.f32 %v690_v58, %v585_v56  ;;  %v692_v62 = vpop.f32.mrb[5].mxu0 }
 0x105   : > { %v1330_v63 = vpack.c.bf16 %v719_v60, %v717_v54  ;;  %v693_v0 = vadd.f32 %v692_v62, %v585_v56  ;;  %v720_v3 = vsel %vm704_vm15, %v687_v53, %v712_v57  ;;  %v889_v56 = vld [vmem:[%s1915_s6 + $0x18] sm:$0xff]  ;;  %v891_v62 = vld [vmem:[%s1916_s7 + $0x8] sm:$0xff] }
 0x106   : > { %v1328_v4 = vpack.c.bf16 %v720_v3, %v718_v59  ;;  %v713_v8 = vmul.f32 0.01, %v691_v61  ;;  %vm705_vm0 = vcmp.gt.f32.partialorder %v691_v61, 0.0 }
 0x107   : > { %v696_v7 = vpop.f32.mrb[6].mxu0  ;;  %v714_v12 = vmul.f32 0.01, %v693_v0  ;;  %vm706_vm2 = vcmp.gt.f32.partialorder %v693_v0, 0.0 }
 0x108   : > { %v697_v10 = vadd.f32 %v696_v7, %v590_v5  ;;  %v698_v11 = vpop.f32.mrb[7].mxu0  ;;  %1329 = vmatprep.subr.bf16.mxu0 %v1328_v4  ;;  %v721_v15 = vsel %vm705_vm0, %v691_v61, %v713_v8  ;;  %v890_v61 = vld [vmem:[%s1916_s7] sm:$0xff] }
 0x109   : > { %v699_v13 = vadd.f32 %v698_v11, %v590_v5  ;;  %1331 = vmatpush1.bf16.msra.mxu0 %v1330_v63  ;;  %v722_v22 = vsel %vm706_vm2, %v693_v0, %v714_v12  ;;  %v892_v63 = vld [vmem:[%s1916_s7 + $0x10] sm:$0xff]  ;;  %v893_v0 = vld [vmem:[%s1916_s7 + $0x18] sm:$0xff] }
 0x10a   : > { %vm707_vm3 = vcmp.gt.f32.partialorder %v697_v10, 0.0  ;;  %v715_v14 = vmul.f32 0.01, %v697_v10 }
 0x10b   : > { %vm708_vm4 = vcmp.gt.f32.partialorder %v699_v13, 0.0  ;;  %v716_v6 = vmul.f32 0.01, %v699_v13  ;;  %v839_v16 = vpop.f32.mrb[0].mxu1 }
 0x10c   : > { %v723_v17 = vsel %vm707_vm3, %v697_v10, %v715_v14  ;;  %v840_v19 = vadd.f32 %v839_v16, %v736_v41  ;;  %v841_v20 = vpop.f32.mrb[1].mxu1 }
 0x10d   : > { %v1334_v21 = vpack.c.bf16 %v723_v17, %v721_v15  ;;  %v724_v2 = vsel %vm708_vm4, %v699_v13, %v716_v6  ;;  %v842_v9 = vadd.f32 %v841_v20, %v736_v41 }
 0x10e   : > { %v1332_v23 = vpack.c.bf16 %v724_v2, %v722_v22  ;;  %v870_v25 = vmul.f32 0.01, %v840_v19  ;;  %vm862_vm6 = vcmp.gt.f32.partialorder %v840_v19, 0.0  ;;  %v1109_v22 = vpop.permute.xlu1 %1108 }
 0x10f   : > { %v845_v24 = vpop.f32.mrb[2].mxu1  ;;  %v871_v31 = vmul.f32 0.01, %v842_v9  ;;  %vm863_vm7 = vcmp.gt.f32.partialorder %v842_v9, 0.0 }
 0x110   : > { %1333 = vmatprep.subr.bf16.mxu0 %v1332_v23  ;;  %v846_v26 = vadd.f32 %v845_v24, %v741_v52  ;;  %v847_v27 = vpop.f32.mrb[3].mxu1  ;;  %v878_v36 = vsel %vm862_vm6, %v840_v19, %v870_v25 }
 0x111   : > { %1335 = vmatpush1.bf16.msra.mxu0 %v1334_v21  ;;  %v848_v29 = vadd.f32 %v847_v27, %v741_v52  ;;  %v879_v41 = vsel %vm863_vm7, %v842_v9, %v871_v31 }
 0x112   : > { %vm864_vm8 = vcmp.gt.f32.partialorder %v846_v26, 0.0  ;;  %v872_v32 = vmul.f32 0.01, %v846_v26 }
 0x113   : > { %vm865_vm9 = vcmp.gt.f32.partialorder %v848_v29, 0.0  ;;  %v873_v34 = vmul.f32 0.01, %v848_v29  ;;  %v851_v35 = vpop.f32.mrb[4].mxu1 }
 0x114   : > { %1296 = vmatmul.mubr.msk.f32.vlgmr.msra.gmra.mrb[8].mxu0 %vm894_vm5, %v886_v30  ;;  %v880_v37 = vsel %vm864_vm8, %v846_v26, %v872_v32  ;;  %v852_v18 = vadd.f32 %v851_v35, %v746_v33  ;;  %v853_v28 = vpop.f32.mrb[5].mxu1 }
 0x115   : > { %1078 = vmatprep.mubr.f32.mxu0 %v1485_v1  ;;  %v1322_v39 = vpack.c.bf16 %v880_v37, %v878_v36  ;;  %v854_v40 = vadd.f32 %v853_v28, %v746_v33  ;;  %v881_v42 = vsel %vm865_vm9, %v848_v29, %v873_v34  ;;  %v1119_v37 = vpop.permute.xlu1 %1118 }
 0x116   : > { %v1320_v43 = vpack.c.bf16 %v881_v42, %v879_v41  ;;  %v874_v46 = vmul.f32 0.01, %v852_v18  ;;  %vm866_vm10 = vcmp.gt.f32.partialorder %v852_v18, 0.0 }
 0x117   : > { %v857_v45 = vpop.f32.mrb[6].mxu1  ;;  %v875_v50 = vmul.f32 0.01, %v854_v40  ;;  %vm867_vm11 = vcmp.gt.f32.partialorder %v854_v40, 0.0 }
 0x118   : > { %1297 = vmatmul.mubr.msk.f32.gmra.mrb[10].mxu0 %vm894_vm5, %v887_v38  ;;  %v858_v47 = vadd.f32 %v857_v45, %v751_v44  ;;  %v859_v48 = vpop.f32.mrb[7].mxu1  ;;  %1321 = vmatprep.subr.bf16.mxu1 %v1320_v43  ;;  %v882_v54 = vsel %vm866_vm10, %v852_v18, %v874_v46 }
 0x119   : > { %1084 = vmatprep.mubr.f32.mxu0 %v1485_v1  ;;  %v860_v51 = vadd.f32 %v859_v48, %v751_v44  ;;  %1323 = vmatpush1.bf16.msra.mxu1 %v1322_v39  ;;  %v883_v58 = vsel %vm867_vm11, %v854_v40, %v875_v50 }
 0x11a   : > { %vm868_vm12 = vcmp.gt.f32.partialorder %v858_v47, 0.0  ;;  %v876_v52 = vmul.f32 0.01, %v858_v47 }
 0x11b   : > { %vm869_vm1 = vcmp.gt.f32.partialorder %v860_v51, 0.0  ;;  %v877_v53 = vmul.f32 0.01, %v860_v51 }
 0x11c   : > { %1298 = vmatmul.mubr.msk.f32.gmra.mrb[12].mxu0 %vm894_vm5, %v888_v49  ;;  %v884_v55 = vsel %vm868_vm12, %v858_v47, %v876_v52 }
 0x11d   : > { %1090 = vmatprep.mubr.f32.mxu0 %v1485_v1  ;;  %v1326_v57 = vpack.c.bf16 %v884_v55, %v882_v54  ;;  %v885_v59 = vsel %vm869_vm1, %v860_v51, %v877_v53 }
 0x11e   : > { %v1324_v60 = vpack.c.bf16 %v885_v59, %v883_v58 }
 0x120   : > { %1299 = vmatmul.mubr.msk.f32.gmra.mrb[14].mxu0 %vm894_vm5, %v889_v56  ;;  %1325 = vmatprep.subr.bf16.mxu1 %v1324_v60 }
 0x121   : > { %1327 = vmatpush1.bf16.msra.mxu1 %v1326_v57 }
 0x124   : > { %1292 = vmatmul.mubr.msk.f32.vlgmr.msra.gmra.mrb[8].mxu1 %vm894_vm5, %v890_v61 }
 0x125   : > { %977 = vmatprep.mubr.f32.mxu1 %v1485_v1 }
 0x128   : > { %1293 = vmatmul.mubr.msk.f32.gmra.mrb[10].mxu1 %vm894_vm5, %v891_v62 }
 0x129   : > { %983 = vmatprep.mubr.f32.mxu1 %v1485_v1 }
 0x12c   : > { %1294 = vmatmul.mubr.msk.f32.gmra.mrb[12].mxu1 %vm894_vm5, %v892_v63 }
 0x12d   : > { %989 = vmatprep.mubr.f32.mxu1 %v1485_v1  ;;  %v1104_v1 = vpop.permute.xlu0 %1103 }
 0x130   : > { %1295 = vmatmul.mubr.msk.f32.gmra.mrb[14].mxu1 %vm894_vm5, %v893_v0 }
 0x131   : > { %v1114_v30 = vpop.permute.xlu0 %1113 }
 0x1e7   : > { %v1074_v3 = vpop.f32.mrb[8].mxu0 }
 0x1e8   : > { %v1076_v4 = vpop.f32.mrb[9].mxu0 }
 0x1eb   : > { %v1080_v5 = vpop.f32.mrb[10].mxu0 }
 0x1ec   : > { %v1082_v7 = vpop.f32.mrb[11].mxu0 }
 0x1ef   : > { %v1086_v8 = vpop.f32.mrb[12].mxu0 }
 0x1f0   : > { %v1088_v10 = vpop.f32.mrb[13].mxu0 }
 0x1f3   : > { %v1092_v11 = vpop.f32.mrb[14].mxu0 }
 0x1f4   : > { %v1094_v12 = vpop.f32.mrb[15].mxu0 }
 0x1f7   : > { %v973_v13 = vpop.f32.mrb[8].mxu1 }
 0x1f8   : > { %v1075_v14 = vadd.f32 %v1074_v3, %v973_v13  ;;  %v975_v6 = vpop.f32.mrb[9].mxu1 }
 0x1f9   : > { %v1077_v15 = vadd.f32 %v1076_v4, %v975_v6 }
 0x1fa   : > { %v1121_v16 = vadd.f32 %v1104_v1, %v1075_v14 }
 0x1fb   : > { %v1122_v17 = vadd.f32 %v1104_v1, %v1077_v15  ;;  %v979_v19 = vpop.f32.mrb[10].mxu1 }
 0x1fc   : > { %v1081_v20 = vadd.f32 %v1080_v5, %v979_v19  ;;  %v981_v21 = vpop.f32.mrb[11].mxu1 }
 0x1fd   : > { %v1311_v2 = vpack.c.bf16 %v1122_v17, %v1121_v16  ;;  %v1083_v9 = vadd.f32 %v1082_v7, %v981_v21 }
 0x1fe   : > { %v1123_v23 = vadd.f32 %v1109_v22, %v1081_v20 }
 0x1ff   : > { %1153 = vst [vmem:[%s376_s24] sm:$0xff] %v1311_v2  ;;  %v1124_v24 = vadd.f32 %v1109_v22, %v1083_v9  ;;  %v985_v25 = vpop.f32.mrb[12].mxu1 }
 0x200   : > { %v1087_v26 = vadd.f32 %v1086_v8, %v985_v25  ;;  %v987_v27 = vpop.f32.mrb[13].mxu1 }
 0x201   : > { %v1312_v31 = vpack.c.bf16 %v1124_v24, %v1123_v23  ;;  %v1089_v29 = vadd.f32 %v1088_v10, %v987_v27 }
 0x202   : > { %v1125_v32 = vadd.f32 %v1114_v30, %v1087_v26 }
 0x203   : > { %1154 = vst [vmem:[%s376_s24 + $0x8] sm:$0xff] %v1312_v31  ;;  %v1126_v33 = vadd.f32 %v1114_v30, %v1089_v29  ;;  %v991_v34 = vpop.f32.mrb[14].mxu1 }
 0x204   : > { %v1093_v35 = vadd.f32 %v1092_v11, %v991_v34  ;;  %v993_v36 = vpop.f32.mrb[15].mxu1 }
 0x205   : > { %v1313_v18 = vpack.c.bf16 %v1126_v33, %v1125_v32  ;;  %v1095_v28 = vadd.f32 %v1094_v12, %v993_v36 }
 0x206   : > { %v1127_v38 = vadd.f32 %v1119_v37, %v1093_v35 }
 0x207   : > { %1155 = vst [vmem:[%s376_s24 + $0x10] sm:$0xff] %v1313_v18  ;;  %v1128_v39 = vadd.f32 %v1119_v37, %v1095_v28 }
 0x209   : > { %v1314_v40 = vpack.c.bf16 %v1128_v39, %v1127_v38 }
 0x20b   : > { %1156 = vst [vmem:[%s376_s24 + $0x18] sm:$0xff] %v1314_v40 }
 0x20c   : > { %1418 = shalt.err (!%p1415_p5)
}
 0x20d   : > { %s1419_s18 = scalar_lea.hbm %s1859_s28, 512  ;;  %s1423_s26 = scalar_lea.hbm %s1918_s9, 2048 }
 0x20e   : > { %p1420_p6 = scmp.ne.s32.totalorder %s1859_s28, %s1419_s18  ;;  %p1424_p10 = scmp.lt.u32.totalorder %s1859_s28, %s1918_s9 }
 0x20f   : > { %p1425_p11 = scmp.lt.u32.totalorder %s1423_s26, %s1419_s18  ;;  %p1427_p13 = scmp.lt.u32.totalorder %s1419_s18, %s1859_s28 }
 0x210   : > { %p1421_p7 = pnand %p1420_p6, %p1580_p4 }
 0x211   : > { %p1426_p12 = por %p1425_p11, %p1424_p10 }
 0x212   : > { %p1422_p9 = pneg %p1421_p7 }
 0x213   : > { %p1428_p0 = por %p1427_p13, %p1426_p12 }
 0x215   : > { %p1429_p1 = pnand %p1428_p0, %p1422_p9 }
 0x217   : > { %1432 = shalt.err (!%p1429_p1)
}
 0x218   : > { %s1488_s15 = smov 128   ;;  %s1489_s16 = smov 8  }
 0x219   : > { %1344 = dma.vmem_to_hbm [thread:$0]  (%p1580_p4), %s1854_s23, 512, %s1859_s28, %s1863_s29, %s1488_s15, %s1488_s15, %s1489_s16  }
 0x21a PF: > { %p1350_p2 = scmp.ge.s32.totalorder %s1483_s14, 2  ;;  %s1188_s20 = sand.u32 1, %s1463_s30  }
 0x21b   : > { %s1189_s18 = scalar_lea.sflag [#allocation3], %s1188_s20 }
 0x21c   : > { %p1347_p3 = pnand %p1350_p2, %p1587_p8 }
 0x21e   : > { %1458 = dma.done.wait (!%p1347_p3), %s1189_s18, 512  }
 0x21f   : > { %1460 = vsyncadd (!%p1347_p3), %s1189_s18, 4294966784  ;;  %s22_s14 = sadd.s32 1, %s1483_s14   ;;  %s1921_s30 = smov %s1467_s10 }
 0x220   : > { %p19_p5 = scmp.ge.s32.totalorder %s22_s14, 6   ;;  %s1922_s10 = smov %s1471_s11 }
 0x221   : > { %s1923_s11 = smov %s1593_s22  ;;  %s1924_s12 = smov %s1479_s13 }
 0x222   : > { %s1925_s13 = smov %s1927_s17  ;;  %21 = sbr.rel (!%p19_p5) target bundleno = 4 (0x4), region = 94 }
 0x229   :  { %1194 = vsyncpa [#allocation3], 1 }
 0x22a   :  { %1196 = vsyncpa [#allocation3 + $0x1], 1 }

</bundles_post_ra>
